<compile_context>
chip_gen: v7x
topology: tpu7x:2x2x1
jax: 0.10.0
libtpu: 0.0.40
codegen_flags: <defaults>
</compile_context>

<pallas_src>
import jax
import jax.numpy as jnp
from jax.experimental import pallas as pl
from jax.experimental.pallas import tpu as pltpu


_LANE = 128
_SUBLANE = 8


def _round_up(n, m):
    return (n + m - 1) // m * m


def mlp_kernel(x_ref, w_ref, bn_ref, out_ref):
    """Fused 4-layer binarized MLP (eval mode).

    x_ref  : (Bp, P)    bf16  zero-padded activations
    w_ref  : (4, P, P)  bf16  pre-binarized (+/-1) weights, (in, out) layout,
                               zero-padded rows/cols
    bn_ref : (8, P)     f32   rows 2k, 2k+1 = (t_k, m_k) for layers 1..3,
                               rows 6, 7     = (s4, b4) affine for layer 4
    out_ref: (Bp, P)    f32
    """
    f32 = jnp.float32
    bf16 = jnp.bfloat16

    def layer(h_bf16, k):
        # BinarizedLinear: y = h @ sign(W)^T  (weights already binarized+transposed)
        y = jnp.dot(h_bf16, w_ref[k], preferred_element_type=f32)
        # BatchNorm + binary tanh folded into a threshold compare producing +/-1.
        t = bn_ref[2 * k:2 * k + 1, :]
        m = bn_ref[2 * k + 1:2 * k + 2, :]
        return jnp.where(y >= t, m, -m).astype(bf16)

    h = x_ref[...]
    h = layer(h, 0)          # dense1 -> bn1 -> tanh (dropout = identity in eval)
    h = layer(h, 1)          # dense2 -> bn2 -> tanh
    h = layer(h, 2)          # dense3 -> bn3 -> tanh

    # layer 4: BinarizedLinear -> BatchNorm (no activation)
    y = jnp.dot(h, w_ref[3], preferred_element_type=f32)
    s4 = bn_ref[6:7, :]
    b4 = bn_ref[7:8, :]
    out_ref[...] = y * s4 + b4


def net_forward(x, params, input_features):
    """Wrapper: view(-1, F), fold/pack params, pad to lane-dense tiles, call kernel."""
    x2d = x.reshape(-1, input_features).astype(jnp.float32)
    B, F = x2d.shape
    H = params["w1"].shape[0]
    O = params["w4"].shape[0]

    P = max(_round_up(F, _LANE), _round_up(H, _LANE), _round_up(O, _LANE))
    Bp = _round_up(B, _SUBLANE)

    def sign(v):
        return jnp.where(v >= 0.0, 1.0, -1.0).astype(jnp.float32)

    def prep_w(w):
        # sign(W).T -> (in, out), zero-pad to (P, P), bf16 (+/-1 is exact in bf16).
        wb = sign(w).T
        i, o = wb.shape
        return jnp.pad(wb, ((0, P - i), (0, P - o))).astype(jnp.bfloat16)

    w_stack = jnp.stack([prep_w(params["w1"]), prep_w(params["w2"]),
                         prep_w(params["w3"]), prep_w(params["w4"])])  # (4, P, P)

    def bn_fold(gamma, beta, mean, var, eps=1e-5):
        s = gamma / jnp.sqrt(var + eps)
        b = beta - mean * s
        return s.astype(jnp.float32), b.astype(jnp.float32)

    def thresh(gamma, beta, mean, var):
        s, b = bn_fold(gamma, beta, mean, var)
        t = -b / s
        m = jnp.where(s >= 0.0, 1.0, -1.0).astype(jnp.float32)
        n = t.shape[0]
        # padded lanes: t=0, m=+1 (harmless: they feed zero weight rows next layer)
        t = jnp.pad(t, (0, P - n))
        m = jnp.pad(m, (0, P - n), constant_values=1.0)
        return t, m

    t1, m1 = thresh(params["g1"], params["be1"], params["m1"], params["v1"])
    t2, m2 = thresh(params["g2"], params["be2"], params["m2"], params["v2"])
    t3, m3 = thresh(params["g3"], params["be3"], params["m3"], params["v3"])
    s4, b4 = bn_fold(params["g4"], params["be4"], params["m4"], params["v4"])
    s4 = jnp.pad(s4, (0, P - s4.shape[0]))
    b4 = jnp.pad(b4, (0, P - b4.shape[0]))

    bn_slab = jnp.stack([t1, m1, t2, m2, t3, m3, s4, b4])  # (8, P) f32

    # zero-pad batch rows and feature lanes; cast input to bf16 for the MXU.
    xp = jnp.zeros((Bp, P), jnp.bfloat16).at[:B, :F].set(x2d.astype(jnp.bfloat16))

    vmem = pl.BlockSpec(memory_space=pltpu.MemorySpace.VMEM)
    out = pl.pallas_call(
        mlp_kernel,
        out_shape=jax.ShapeDtypeStruct((Bp, P), jnp.float32),
        in_specs=[vmem, vmem, vmem],
        out_specs=vmem,
    )(xp, w_stack, bn_slab)

    return out[:B, :O]


def make_params(key, input_features, hidden_units, output_features):
    ks = jax.random.split(key, 8)

    def lin(k, out_f, in_f):
        # weights are clamp_(-1, 1)'d in training; mimic that range
        return jax.random.uniform(k, (out_f, in_f), jnp.float32, -1.0, 1.0)

    params = {
        "w1": lin(ks[0], hidden_units, input_features),
        "w2": lin(ks[1], hidden_units, hidden_units),
        "w3": lin(ks[2], hidden_units, hidden_units),
        "w4": lin(ks[3], output_features, hidden_units),
    }

    def bn(k, n):
        k1, k2, k3, k4 = jax.random.split(k, 4)
        gamma = 1.0 + 0.1 * jax.random.normal(k1, (n,), jnp.float32)
        beta = 0.1 * jax.random.normal(k2, (n,), jnp.float32)
        mean = 0.1 * jax.random.normal(k3, (n,), jnp.float32)
        var = jnp.abs(1.0 + 0.1 * jax.random.normal(k4, (n,), jnp.float32))
        return gamma, beta, mean, var

    params["g1"], params["be1"], params["m1"], params["v1"] = bn(ks[4], hidden_units)
    params["g2"], params["be2"], params["m2"], params["v2"] = bn(ks[5], hidden_units)
    params["g3"], params["be3"], params["m3"], params["v3"] = bn(ks[6], hidden_units)
    params["g4"], params["be4"], params["m4"], params["v4"] = bn(ks[7], output_features)
    return params


if __name__ == "__main__":
    key = jax.random.PRNGKey(0)
    k_x, k_p = jax.random.split(key)

    input_features = 32
    hidden_units = 32
    output_features = 16
    npasses = 3  # averaging is exact with deterministic binarization (single pass)

    # input: (2, 4, 32) -> view(-1, 32) inside the wrapper -> (8, 32)
    x = jax.random.normal(k_x, (2, 4, input_features), jnp.float32)
    params = make_params(k_p, input_features, hidden_units, output_features)

    out = net_forward(x, params, input_features)
    out = jax.block_until_ready(out)

    assert out.shape == (8, output_features), out.shape
    assert jnp.all(jnp.isfinite(out))
    print("KERNEL_OK")
</pallas_src>

<mosaic_0001>
module attributes {stable_mosaic.version = 11 : i64} {
  func.func @mlp_kernel(%arg0: memref<8x128xbf16, #tpu.memory_space<vmem>>, %arg1: memref<4x128x128xbf16, #tpu.memory_space<vmem>>, %arg2: memref<8x128xf32, #tpu.memory_space<vmem>>, %arg3: memref<8x128xf32, #tpu.memory_space<vmem>>) attributes {dimension_semantics = [], scalar_prefetch = 0 : i64, scratch_operands = 0 : i64, tpu.core_type = #tpu.core_type<tc>} {
    %c0 = arith.constant 0 : index
    %c0_0 = arith.constant 0 : index
    %0 = vector.load %arg0[%c0, %c0_0] : memref<8x128xbf16, #tpu.memory_space<vmem>>, vector<8x128xbf16>
    %c0_1 = arith.constant 0 : index
    %c0_2 = arith.constant 0 : index
    %c0_3 = arith.constant 0 : index
    %1 = vector.load %arg1[%c0_1, %c0_2, %c0_3] : memref<4x128x128xbf16, #tpu.memory_space<vmem>>, vector<1x128x128xbf16>
    %2 = vector.shape_cast %1 : vector<1x128x128xbf16> to vector<128x128xbf16>
    %cst = arith.constant dense<0.000000e+00> : vector<8x128xf32>
    %3 = tpu.matmul %0, %2, %cst {dimension_numbers = #tpu.dot_dimension_numbers<[1], [0], [0], [1], [0, 0, 1, 1], [], []>} : vector<8x128xbf16>, vector<128x128xbf16>, vector<8x128xf32> -> vector<8x128xf32>
    %c0_4 = arith.constant 0 : index
    %c0_5 = arith.constant 0 : index
    %4 = vector.load %arg2[%c0_4, %c0_5] : memref<8x128xf32, #tpu.memory_space<vmem>>, vector<1x128xf32>
    %c1 = arith.constant 1 : index
    %c0_6 = arith.constant 0 : index
    %5 = vector.load %arg2[%c1, %c0_6] : memref<8x128xf32, #tpu.memory_space<vmem>>, vector<1x128xf32>
    %6 = vector.broadcast %4 : vector<1x128xf32> to vector<8x128xf32>
    %7 = arith.cmpf oge, %3, %6 : vector<8x128xf32>
    %cst_7 = arith.constant 0.000000e+00 : f32
    %8 = vector.broadcast %cst_7 : f32 to vector<1x128xf32>
    %9 = arith.subf %8, %5 : vector<1x128xf32>
    %10 = vector.shape_cast %5 : vector<1x128xf32> to vector<1x128xf32>
    %11 = vector.broadcast %10 : vector<1x128xf32> to vector<8x128xf32>
    %12 = vector.shape_cast %9 : vector<1x128xf32> to vector<1x128xf32>
    %13 = vector.broadcast %12 : vector<1x128xf32> to vector<8x128xf32>
    %14 = arith.select %7, %11, %13 : vector<8x128xi1>, vector<8x128xf32>
    %15 = arith.truncf %14 : vector<8x128xf32> to vector<8x128xbf16>
    %c1_8 = arith.constant 1 : index
    %c0_9 = arith.constant 0 : index
    %c0_10 = arith.constant 0 : index
    %16 = vector.load %arg1[%c1_8, %c0_9, %c0_10] : memref<4x128x128xbf16, #tpu.memory_space<vmem>>, vector<1x128x128xbf16>
    %17 = vector.shape_cast %16 : vector<1x128x128xbf16> to vector<128x128xbf16>
    %cst_11 = arith.constant dense<0.000000e+00> : vector<8x128xf32>
    %18 = tpu.matmul %15, %17, %cst_11 {dimension_numbers = #tpu.dot_dimension_numbers<[1], [0], [0], [1], [0, 0, 1, 1], [], []>} : vector<8x128xbf16>, vector<128x128xbf16>, vector<8x128xf32> -> vector<8x128xf32>
    %c2 = arith.constant 2 : index
    %c0_12 = arith.constant 0 : index
    %19 = vector.load %arg2[%c2, %c0_12] : memref<8x128xf32, #tpu.memory_space<vmem>>, vector<1x128xf32>
    %c3 = arith.constant 3 : index
    %c0_13 = arith.constant 0 : index
    %20 = vector.load %arg2[%c3, %c0_13] : memref<8x128xf32, #tpu.memory_space<vmem>>, vector<1x128xf32>
    %21 = vector.broadcast %19 : vector<1x128xf32> to vector<8x128xf32>
    %22 = arith.cmpf oge, %18, %21 : vector<8x128xf32>
    %cst_14 = arith.constant 0.000000e+00 : f32
    %23 = vector.broadcast %cst_14 : f32 to vector<1x128xf32>
    %24 = arith.subf %23, %20 : vector<1x128xf32>
    %25 = vector.shape_cast %20 : vector<1x128xf32> to vector<1x128xf32>
    %26 = vector.broadcast %25 : vector<1x128xf32> to vector<8x128xf32>
    %27 = vector.shape_cast %24 : vector<1x128xf32> to vector<1x128xf32>
    %28 = vector.broadcast %27 : vector<1x128xf32> to vector<8x128xf32>
    %29 = arith.select %22, %26, %28 : vector<8x128xi1>, vector<8x128xf32>
    %30 = arith.truncf %29 : vector<8x128xf32> to vector<8x128xbf16>
    %c2_15 = arith.constant 2 : index
    %c0_16 = arith.constant 0 : index
    %c0_17 = arith.constant 0 : index
    %31 = vector.load %arg1[%c2_15, %c0_16, %c0_17] : memref<4x128x128xbf16, #tpu.memory_space<vmem>>, vector<1x128x128xbf16>
    %32 = vector.shape_cast %31 : vector<1x128x128xbf16> to vector<128x128xbf16>
    %cst_18 = arith.constant dense<0.000000e+00> : vector<8x128xf32>
    %33 = tpu.matmul %30, %32, %cst_18 {dimension_numbers = #tpu.dot_dimension_numbers<[1], [0], [0], [1], [0, 0, 1, 1], [], []>} : vector<8x128xbf16>, vector<128x128xbf16>, vector<8x128xf32> -> vector<8x128xf32>
    %c4 = arith.constant 4 : index
    %c0_19 = arith.constant 0 : index
    %34 = vector.load %arg2[%c4, %c0_19] : memref<8x128xf32, #tpu.memory_space<vmem>>, vector<1x128xf32>
    %c5 = arith.constant 5 : index
    %c0_20 = arith.constant 0 : index
    %35 = vector.load %arg2[%c5, %c0_20] : memref<8x128xf32, #tpu.memory_space<vmem>>, vector<1x128xf32>
    %36 = vector.broadcast %34 : vector<1x128xf32> to vector<8x128xf32>
    %37 = arith.cmpf oge, %33, %36 : vector<8x128xf32>
    %cst_21 = arith.constant 0.000000e+00 : f32
    %38 = vector.broadcast %cst_21 : f32 to vector<1x128xf32>
    %39 = arith.subf %38, %35 : vector<1x128xf32>
    %40 = vector.shape_cast %35 : vector<1x128xf32> to vector<1x128xf32>
    %41 = vector.broadcast %40 : vector<1x128xf32> to vector<8x128xf32>
    %42 = vector.shape_cast %39 : vector<1x128xf32> to vector<1x128xf32>
    %43 = vector.broadcast %42 : vector<1x128xf32> to vector<8x128xf32>
    %44 = arith.select %37, %41, %43 : vector<8x128xi1>, vector<8x128xf32>
    %45 = arith.truncf %44 : vector<8x128xf32> to vector<8x128xbf16>
    %c3_22 = arith.constant 3 : index
    %c0_23 = arith.constant 0 : index
    %c0_24 = arith.constant 0 : index
    %46 = vector.load %arg1[%c3_22, %c0_23, %c0_24] : memref<4x128x128xbf16, #tpu.memory_space<vmem>>, vector<1x128x128xbf16>
    %47 = vector.shape_cast %46 : vector<1x128x128xbf16> to vector<128x128xbf16>
    %cst_25 = arith.constant dense<0.000000e+00> : vector<8x128xf32>
    %48 = tpu.matmul %45, %47, %cst_25 {dimension_numbers = #tpu.dot_dimension_numbers<[1], [0], [0], [1], [0, 0, 1, 1], [], []>} : vector<8x128xbf16>, vector<128x128xbf16>, vector<8x128xf32> -> vector<8x128xf32>
    %c6 = arith.constant 6 : index
    %c0_26 = arith.constant 0 : index
    %49 = vector.load %arg2[%c6, %c0_26] : memref<8x128xf32, #tpu.memory_space<vmem>>, vector<1x128xf32>
    %c7 = arith.constant 7 : index
    %c0_27 = arith.constant 0 : index
    %50 = vector.load %arg2[%c7, %c0_27] : memref<8x128xf32, #tpu.memory_space<vmem>>, vector<1x128xf32>
    %51 = vector.broadcast %49 : vector<1x128xf32> to vector<8x128xf32>
    %52 = arith.mulf %48, %51 : vector<8x128xf32>
    %53 = vector.broadcast %50 : vector<1x128xf32> to vector<8x128xf32>
    %54 = arith.addf %52, %53 : vector<8x128xf32>
    %c0_28 = arith.constant 0 : index
    %c0_29 = arith.constant 0 : index
    %55 = vector.load %arg3[%c0_28, %c0_29] : memref<8x128xf32, #tpu.memory_space<vmem>>, vector<8x128xf32>
    tpu.vector_store %arg3[%c0_28, %c0_29], %54 {strides = array<i32>} : memref<8x128xf32, #tpu.memory_space<vmem>>, vector<8x128xf32>,
    return
  }
}

</mosaic_0001>

<bundles_post_ra>
// kernel: tpu_custom_call.1
= control target key start
LH: loop header
LB: loop body
LE: loop exit
PB: predicated region body
PF: predicated region fallthrough
CT: control target
= control target key end

     0   :  { %8 = vsyncpa [#allocation3], 0  ;;  %s959_s0 = inlined_call_operand.hbm [shape: bf16[8,128], index: 0, kind: input, shape index: {}]   ;;  %s960_s1 = inlined_call_operand.hbm [shape: bf16[4,128,128], index: 1, kind: input, shape index: {}]   ;;  %s961_s2 = inlined_call_operand.hbm [shape: f32[8,128], index: 2, kind: input, shape index: {}]   ;;  %s962_s3 = inlined_call_operand.hbm [shape: f32[8,128], index: 3, kind: output, shape index: {}]  }
   0x1   :  { %9 = vsyncpa [#allocation6], 0 }
   0x2   :  { %10 = vsyncpa [#allocation4], 0  ;;  %s843_s12 = smov [#allocation5]   ;;  %s749_s16 = scalar_lea.hbm %s960_s1, 4096 }
   0x3   :  { %s26_s13 = sshll.u32 %s843_s12, 4  ;;  %p750_p0 = scmp.ne.s32.totalorder %s960_s1, %s749_s16  ;;  %s27_s13 = int_to_ptr.vmem [resolvable:$true] %s26_s13 }
   0x4   :  { %p753_p1 = scmp.lt.u32.totalorder %s749_s16, %s960_s1 }
   0x6   :  { %p755_p2 = pnand %p753_p1, %p750_p0 }
   0x8   :  { %758 = shalt.err (!%p755_p2)
}
   0x9   :  { %s759_s21 = scalar_lea.vmem %s27_s13, 4096  ;;  %p764_p4 = scmp.lt.s32.totalorder %s27_s13, %s27_s13 }
   0xa   :  { %p760_p3 = scmp.ne.s32.totalorder %s27_s13, %s759_s21  ;;  %p765_p5 = scmp.lt.s32.totalorder %s759_s21, %s759_s21 }
   0xc   :  { %p766_p6 = por %p765_p5, %p764_p4 }
   0xe   :  { %p767_p7 = pnand %p766_p6, %p760_p3 }
  0x10   :  { %770 = shalt.err (!%p767_p7)
}
  0x11   :  { %s844_s22 = smov 64   ;;  %s845_s23 = smov 4  }
  0x12   :  { %32 = dma.hbm_to_vmem [thread:$0]  %s960_s1, 4096, %s27_s13, [#allocation6], %s844_s22, %s844_s22, %s845_s23  }
  0x13   :  { %s846_s26 = smov [#allocation2]   ;;  %s847_s28 = smov [#allocation7]  }
  0x14   :  { %s17_s27 = sshll.u32 %s846_s26, 4  ;;  %s39_s29 = sshll.u32 %s847_s28, 4  ;;  %s18_s27 = int_to_ptr.vmem [resolvable:$true] %s17_s27  ;;  %s40_s29 = int_to_ptr.vmem [resolvable:$true] %s39_s29 }
  0x15   :  { %s771_s5 = scalar_lea.hbm %s959_s0, 64 }
  0x16   :  { %p772_p8 = scmp.ne.s32.totalorder %s959_s0, %s771_s5  ;;  %p775_p9 = scmp.lt.u32.totalorder %s771_s5, %s959_s0 }
  0x18   :  { %p777_p10 = pnand %p775_p9, %p772_p8 }
  0x1a   :  { %780 = shalt.err (!%p777_p10)
}
  0x1b   :  { %s781_s1 = scalar_lea.vmem %s18_s27, 64  ;;  %p786_p12 = scmp.lt.s32.totalorder %s18_s27, %s18_s27 }
  0x1c   :  { %p782_p11 = scmp.ne.s32.totalorder %s18_s27, %s781_s1  ;;  %p787_p13 = scmp.lt.s32.totalorder %s781_s1, %s781_s1 }
  0x1e   :  { %p788_p0 = por %p787_p13, %p786_p12 }
  0x20   :  { %p789_p1 = pnand %p788_p0, %p782_p11 }
  0x22   :  { %792 = shalt.err (!%p789_p1)
}
  0x23   :  { %20 = dma.hbm_to_vmem [thread:$0]  %s959_s0, 64, %s18_s27, [#allocation3]  }
  0x24   :  { %s793_s14 = scalar_lea.hbm %s961_s2, 128 }
  0x25   :  { %p794_p2 = scmp.ne.s32.totalorder %s961_s2, %s793_s14  ;;  %p797_p3 = scmp.lt.u32.totalorder %s793_s14, %s961_s2 }
  0x27   :  { %p799_p4 = pnand %p797_p3, %p794_p2 }
  0x29   :  { %802 = shalt.err (!%p799_p4)
}
  0x2a   :  { %s803_s19 = scalar_lea.vmem %s40_s29, 128  ;;  %p808_p6 = scmp.lt.s32.totalorder %s40_s29, %s40_s29 }
  0x2b   :  { %p804_p5 = scmp.ne.s32.totalorder %s40_s29, %s803_s19  ;;  %p809_p7 = scmp.lt.s32.totalorder %s803_s19, %s803_s19 }
  0x2d   :  { %p810_p8 = por %p809_p7, %p808_p6 }
  0x2f   :  { %p811_p9 = pnand %p810_p8, %p804_p5 }
  0x31   :  { %814 = shalt.err (!%p811_p9)
}
  0x32   :  { %42 = dma.hbm_to_vmem [thread:$0]  %s961_s2, 128, %s40_s29, [#allocation6]  }
  0x33   :  { %837 = dma.done.wait [#allocation3], 64  }
  0x34   :  { %838 = vsyncadd [#allocation3], 4294967232 }
  0x35   :  { %839 = dma.done.wait [#allocation6], 4224  }
  0x36   :  { %840 = vsyncadd [#allocation6], 4294963072  ;;  %v848_v0 = vmov 0.0   ;;  %vm849_vm0 = vmmov 0   ;;  %v717_v1 = vld [vmem:[#allocation5] sm:$0xff]   ;;  %v718_v2 = vld [vmem:[#allocation5 + $0x8] sm:$0xff]   ;;  %v166_v25 = vlaneseq }
  0x37   :  { %629 = vmatprep.subr.bf16.mxu0 %v848_v0  ;;  %645 = vmatprep.mubr.msk.bf16.mxu0 %vm849_vm0, %v848_v0  ;;  %v719_v3 = vld [vmem:[#allocation5 + $0x10] sm:$0xff]   ;;  %v725_v4 = vld [vmem:[#allocation5 + $0x40] sm:$0xff]   ;;  %v720_v5 = vld [vmem:[#allocation5 + $0x18] sm:$0xff]   ;;  %s850_s2 = smov [#allocation8]  }
  0x38   :  { %649 = vmatprep.subr.bf16.mxu1 %v848_v0  ;;  %665 = vmatprep.mubr.msk.bf16.mxu1 %vm849_vm0, %v848_v0  ;;  %v726_v6 = vld [vmem:[#allocation5 + $0x48] sm:$0xff]   ;;  %v721_v7 = vld [vmem:[#allocation5 + $0x20] sm:$0xff]   ;;  %v727_v8 = vld [vmem:[#allocation5 + $0x50] sm:$0xff]   ;;  %v167_v26 = vshrl.u32 %v166_v25, 7  ;;  %s546_s21 = sshll.u32 %s850_s2, 4  ;;  %s547_s21 = int_to_ptr.vmem [resolvable:$true] %s546_s21 }
  0x39   :  { %630 = vmatpush3.bf16.msra.mxu0 %v717_v1  ;;  %650 = vmatpush3.bf16.msra.mxu1 %v725_v4  ;;  %v722_v9 = vld [vmem:[#allocation5 + $0x28] sm:$0xff]   ;;  %v728_v10 = vld [vmem:[#allocation5 + $0x58] sm:$0xff]   ;;  %v723_v11 = vld [vmem:[#allocation5 + $0x30] sm:$0xff]   ;;  %s815_s22 = scalar_lea.vmem %s547_s21, 128  ;;  %p820_p11 = scmp.lt.s32.totalorder %s547_s21, %s547_s21 }
  0x3a   :  { %631 = vmatprep.subr.bf16.mxu0 %v848_v0  ;;  %651 = vmatprep.subr.bf16.mxu1 %v848_v0  ;;  %v729_v12 = vld [vmem:[#allocation5 + $0x60] sm:$0xff]   ;;  %v724_v13 = vld [vmem:[#allocation5 + $0x38] sm:$0xff]   ;;  %v730_v14 = vld [vmem:[#allocation5 + $0x68] sm:$0xff]   ;;  %v168_v29 = vsub.s32 0, %v167_v26  ;;  %p816_p10 = scmp.ne.s32.totalorder %s547_s21, %s815_s22  ;;  %p821_p12 = scmp.lt.s32.totalorder %s815_s22, %s815_s22 }
  0x3b   :  { %v53_v15 = vld [vmem:[#allocation2] sm:$0xf]  ;;  %v731_v16 = vld [vmem:[#allocation5 + $0x70] sm:$0xff]   ;;  %v733_v18 = vld [vmem:[#allocation5 + $0x80] sm:$0xff]  }
  0x3c   :  { %v732_v17 = vld [vmem:[#allocation5 + $0x78] sm:$0xff]   ;;  %v734_v19 = vld [vmem:[#allocation5 + $0x88] sm:$0xff]   ;;  %v735_v20 = vld [vmem:[#allocation5 + $0x90] sm:$0xff]   ;;  %p822_p13 = por %p821_p12, %p820_p11 }
  0x3d   :  { %632 = vmatpush3.bf16.msra.mxu0 %v718_v2  ;;  %652 = vmatpush3.bf16.msra.mxu1 %v726_v6  ;;  %v736_v21 = vld [vmem:[#allocation5 + $0x98] sm:$0xff]   ;;  %v737_v22 = vld [vmem:[#allocation5 + $0xa0] sm:$0xff]   ;;  %v738_v23 = vld [vmem:[#allocation5 + $0xa8] sm:$0xff]  }
  0x3e   :  { %633 = vmatprep.subr.bf16.mxu0 %v848_v0  ;;  %653 = vmatprep.subr.bf16.mxu1 %v848_v0  ;;  %v739_v24 = vld [vmem:[#allocation5 + $0xb0] sm:$0xff]   ;;  %v159_v27 = vld [vmem:[#allocation7 + $0x1] sm:$0x1]  ;;  %v564_v30 = vld [vmem:[#allocation7] ss:$0 sm:$0xff]  ;;  %p823_p0 = pnand %p822_p13, %p816_p10 }
  0x3f   :  { %v165_v28 = vsub.f32 0.0, %v159_v27  ;;  %v169_v31 = vrot.slane %v159_v27, %v168_v29  ;;  %v740_v39 = vld [vmem:[#allocation5 + $0xb8] sm:$0xff]   ;;  %v741_v40 = vld [vmem:[#allocation5 + $0xc0] sm:$0xff]   ;;  %v742_v41 = vld [vmem:[#allocation5 + $0xc8] sm:$0xff]  }
  0x40   :  { %v743_v42 = vld [vmem:[#allocation5 + $0xd0] sm:$0xff]   ;;  %v744_v43 = vld [vmem:[#allocation5 + $0xd8] sm:$0xff]   ;;  %v745_v44 = vld [vmem:[#allocation5 + $0xe0] sm:$0xff]  }
  0x41   :  { %634 = vmatpush3.bf16.msra.mxu0 %v719_v3  ;;  %654 = vmatpush3.bf16.msra.mxu1 %v727_v8  ;;  %v173_v32 = vrot.slane %v165_v28, %v168_v29  ;;  %v746_v45 = vld [vmem:[#allocation5 + $0xe8] sm:$0xff]   ;;  %v747_v46 = vld [vmem:[#allocation5 + $0xf0] sm:$0xff]   ;;  %v282_v47 = vld [vmem:[#allocation7 + $0x3] sm:$0x1] }
  0x42   :  { %635 = vmatprep.subr.bf16.mxu0 %v848_v0  ;;  %655 = vmatprep.subr.bf16.mxu1 %v848_v0  ;;  %v288_v48 = vsub.f32 0.0, %v282_v47  ;;  %v573_v49 = vld [vmem:[#allocation7 + $0x2] ss:$0 sm:$0xff]  ;;  %v292_v50 = vrot.slane %v282_v47, %v168_v29  ;;  %v748_v58 = vld [vmem:[#allocation5 + $0xf8] sm:$0xff]   ;;  %v405_v59 = vld [vmem:[#allocation7 + $0x5] sm:$0x1] }
  0x43   :  { %v411_v60 = vsub.f32 0.0, %v405_v59  ;;  %v582_v61 = vld [vmem:[#allocation7 + $0x4] ss:$0 sm:$0xff]  ;;  %v415_v62 = vrot.slane %v405_v59, %v168_v29  ;;  %v591_v6 = vld [vmem:[#allocation7 + $0x6] ss:$0 sm:$0xff] }
  0x44   :  { %v296_v51 = vrot.slane %v288_v48, %v168_v29  ;;  %v592_v8 = vld [vmem:[#allocation7 + $0x7] ss:$0 sm:$0xff] }
  0x45   :  { %636 = vmatpush3.bf16.msra.mxu0 %v720_v5  ;;  %656 = vmatpush3.bf16.msra.mxu1 %v728_v10  ;;  %v419_v63 = vrot.slane %v411_v60, %v168_v29 }
  0x46   :  { %637 = vmatprep.subr.bf16.mxu0 %v848_v0  ;;  %657 = vmatprep.subr.bf16.mxu1 %v848_v0 }
  0x49   :  { %638 = vmatpush3.bf16.msra.mxu0 %v721_v7  ;;  %658 = vmatpush3.bf16.msra.mxu1 %v729_v12 }
  0x4a   :  { %639 = vmatprep.subr.bf16.mxu0 %v848_v0  ;;  %659 = vmatprep.subr.bf16.mxu1 %v848_v0 }
  0x4d   :  { %640 = vmatpush3.bf16.msra.mxu0 %v722_v9  ;;  %660 = vmatpush3.bf16.msra.mxu1 %v730_v14 }
  0x4e   :  { %641 = vmatprep.subr.bf16.mxu0 %v848_v0  ;;  %661 = vmatprep.subr.bf16.mxu1 %v848_v0 }
  0x51   :  { %642 = vmatpush3.bf16.msra.mxu0 %v723_v11  ;;  %662 = vmatpush3.bf16.msra.mxu1 %v731_v16 }
  0x52   :  { %643 = vmatprep.subr.bf16.mxu0 %v848_v0  ;;  %663 = vmatprep.subr.bf16.mxu1 %v848_v0 }
  0x55   :  { %644 = vmatpush3.bf16.msra.mxu0 %v724_v13  ;;  %664 = vmatpush3.bf16.msra.mxu1 %v732_v17 }
  0x56   :  { %669 = vmatprep.subr.bf16.mxu0 %v848_v0  ;;  %689 = vmatprep.subr.bf16.mxu1 %v848_v0 }
  0x58   :  { %646 = vmatmul.mubr.bf16.vlgmr.msra.gmra.mrb[0].mxu0 %v53_v15 }
  0x59   :  { %685 = vmatprep.mubr.msk.bf16.mxu0 %vm849_vm0, %v848_v0  ;;  %670 = vmatpush3.bf16.msra.mxu0 %v733_v18 }
  0x5a   :  { %671 = vmatprep.subr.bf16.mxu0 %v848_v0 }
  0x5d   :  { %672 = vmatpush3.bf16.msra.mxu0 %v734_v19 }
  0x5e   :  { %673 = vmatprep.subr.bf16.mxu0 %v848_v0 }
  0x61   :  { %674 = vmatpush3.bf16.msra.mxu0 %v735_v20 }
  0x62   :  { %675 = vmatprep.subr.bf16.mxu0 %v848_v0 }
  0x65   :  { %676 = vmatpush3.bf16.msra.mxu0 %v736_v21 }
  0x66   :  { %677 = vmatprep.subr.bf16.mxu0 %v848_v0 }
  0x69   :  { %678 = vmatpush3.bf16.msra.mxu0 %v737_v22 }
  0x6a   :  { %679 = vmatprep.subr.bf16.mxu0 %v848_v0 }
  0x6d   :  { %680 = vmatpush3.bf16.msra.mxu0 %v738_v23 }
  0x6e   :  { %681 = vmatprep.subr.bf16.mxu0 %v848_v0 }
  0x71   :  { %682 = vmatpush3.bf16.msra.mxu0 %v739_v24 }
  0x72   :  { %683 = vmatprep.subr.bf16.mxu0 %v848_v0 }
  0x75   :  { %684 = vmatpush3.bf16.msra.mxu0 %v740_v39 }
 0x12b   :  { %v152_v33 = vpop.f32.mrb[0].mxu0 }
 0x12c   :  { %vm164_vm1 = vcmp.ge.f32.partialorder %v152_v33, %v564_v30  ;;  %v647_v34 = vpop.f32.mrb[1].mxu0 }
 0x12d   :  { %v174_v35 = vsel %vm164_vm1, %v169_v31, %v173_v32  ;;  %v155_v36 = vpop.f32.mrb[2].mxu0 }
 0x12e   :  { %v175_v37 = vpack.c.bf16 %v174_v35, %v174_v35  ;;  %v648_v38 = vpop.f32.mrb[3].mxu0 }
 0x130   :  { %666 = vmatmul.mubr.bf16.vlgmr.msra.gmra.mrb[0].mxu1 %v175_v37 }
 0x131   :  { %705 = vmatprep.mubr.msk.bf16.mxu1 %vm849_vm0, %v848_v0  ;;  %690 = vmatpush3.bf16.msra.mxu1 %v741_v40 }
 0x132   :  { %691 = vmatprep.subr.bf16.mxu1 %v848_v0 }
 0x135   :  { %692 = vmatpush3.bf16.msra.mxu1 %v742_v41 }
 0x136   :  { %693 = vmatprep.subr.bf16.mxu1 %v848_v0 }
 0x139   :  { %694 = vmatpush3.bf16.msra.mxu1 %v743_v42 }
 0x13a   :  { %695 = vmatprep.subr.bf16.mxu1 %v848_v0 }
 0x13d   :  { %696 = vmatpush3.bf16.msra.mxu1 %v744_v43 }
 0x13e   :  { %697 = vmatprep.subr.bf16.mxu1 %v848_v0 }
 0x141   :  { %698 = vmatpush3.bf16.msra.mxu1 %v745_v44 }
 0x142   :  { %699 = vmatprep.subr.bf16.mxu1 %v848_v0 }
 0x145   :  { %700 = vmatpush3.bf16.msra.mxu1 %v746_v45 }
 0x146   :  { %701 = vmatprep.subr.bf16.mxu1 %v848_v0 }
 0x149   :  { %702 = vmatpush3.bf16.msra.mxu1 %v747_v46 }
 0x14a   :  { %703 = vmatprep.subr.bf16.mxu1 %v848_v0 }
 0x14d   :  { %704 = vmatpush3.bf16.msra.mxu1 %v748_v58 }
 0x203   :  { %v275_v52 = vpop.f32.mrb[0].mxu1 }
 0x204   :  { %vm287_vm2 = vcmp.ge.f32.partialorder %v275_v52, %v573_v49  ;;  %v667_v53 = vpop.f32.mrb[1].mxu1 }
 0x205   :  { %v297_v54 = vsel %vm287_vm2, %v292_v50, %v296_v51  ;;  %v278_v55 = vpop.f32.mrb[2].mxu1 }
 0x206   :  { %v298_v56 = vpack.c.bf16 %v297_v54, %v297_v54  ;;  %v668_v57 = vpop.f32.mrb[3].mxu1 }
 0x208   :  { %686 = vmatmul.mubr.bf16.vlgmr.msra.gmra.mrb[4].mxu0 %v298_v56 }
 0x2db   :  { %v398_v0 = vpop.f32.mrb[4].mxu0 }
 0x2dc   :  { %vm410_vm3 = vcmp.ge.f32.partialorder %v398_v0, %v582_v61  ;;  %v687_v1 = vpop.f32.mrb[5].mxu0 }
 0x2dd   :  { %v420_v2 = vsel %vm410_vm3, %v415_v62, %v419_v63  ;;  %v401_v3 = vpop.f32.mrb[6].mxu0 }
 0x2de   :  { %v421_v4 = vpack.c.bf16 %v420_v2, %v420_v2  ;;  %v688_v5 = vpop.f32.mrb[7].mxu0 }
 0x2e0   :  { %706 = vmatmul.mubr.bf16.vlgmr.msra.gmra.mrb[4].mxu1 %v421_v4 }
 0x3b3   :  { %v521_v7 = vpop.f32.mrb[4].mxu1 }
 0x3b4   :  { %v533_v9 = vmul.f32 %v591_v6, %v521_v7  ;;  %v707_v10 = vpop.f32.mrb[5].mxu1 }
 0x3b5   :  { %v524_v11 = vpop.f32.mrb[6].mxu1 }
 0x3b6   :  { %v538_v12 = vadd.f32 %v592_v8, %v533_v9  ;;  %v708_v13 = vpop.f32.mrb[7].mxu1 }
 0x3b8   :  { %539 = vst [vmem:[#allocation8] sm:$0xff] %v538_v12 }
 0x3b9   :  { %826 = shalt.err (!%p823_p0)
}
 0x3ba   :  { %s827_s25 = scalar_lea.hbm %s962_s3, 128 }
 0x3bb   :  { %p828_p1 = scmp.ne.s32.totalorder %s962_s3, %s827_s25  ;;  %p831_p2 = scmp.lt.u32.totalorder %s827_s25, %s962_s3 }
 0x3bd   :  { %p833_p3 = pnand %p831_p2, %p828_p1 }
 0x3bf   :  { %836 = shalt.err (!%p833_p3)
}
 0x3c0   :  { %549 = dma.vmem_to_hbm [thread:$0]  %s547_s21, 128, %s962_s3, [#allocation4]  }
 0x3c1   :  { %841 = dma.done.wait [#allocation4], 128  }
 0x3c2   :  { %842 = vsyncadd [#allocation4], 4294967168 }
 0x3c3   :  { %553 = vsyncpa [#allocation3], 1 }
 0x3c4   :  { %554 = vsyncpa [#allocation6], 1 }
 0x3c5   :  { %555 = vsyncpa [#allocation4], 1 }

</bundles_post_ra>
